<compile_context>
chip_gen: v6e
topology: v6e:2x2x1
jax: 0.10.0
libtpu: 0.0.40
codegen_flags: <defaults>
</compile_context>

<pallas_src>
import jax
import jax.numpy as jnp
from jax import lax
from jax.experimental import pallas as pl
from jax.experimental.pallas import tpu as pltpu


def _round_up(x, m):
    return ((x + m - 1) // m) * m


def _choose_tm(batch):
    """Batch tile size. Large batches: big tiles (step overhead dominates).
    Mid batches: split into >=2 tiles so the 'parallel' axis can use both
    TensorCores on v7x. Tiny batches: one 8-row-aligned tile."""
    if batch >= 2048:
        return 1024
    if batch >= 1024:
        return 512
    if batch >= 64:
        return _round_up((batch + 1) // 2, 8)
    return _round_up(max(batch, 1), 8)


def qnetwork_kernel(x_ref, w1_ref, b1_ref, w2_ref, b2_ref, out_ref):
    # fc1: [TM, in] @ [in, hidden] -> [TM, hidden], f32 accumulate on the MXU.
    h = jnp.dot(
        x_ref[...], w1_ref[...],
        preferred_element_type=jnp.float32,
        precision=lax.Precision.HIGHEST,
    )
    # Bias + ReLU epilogue on the VPU.
    h = jnp.maximum(h + b1_ref[...], 0.0)
    # fc2: [TM, hidden] @ [hidden, out] -> [TM, out].
    y = jnp.dot(
        h, w2_ref[...],
        preferred_element_type=jnp.float32,
        precision=lax.Precision.HIGHEST,
    )
    out_ref[...] = (y + b2_ref[...]).astype(out_ref.dtype)


def prepare_params(w1, b1, w2, b2):
    """One-time (init-time) parameter prep, outside the hot path:
    transpose PyTorch-native [out, in] weights to MXU-native RHS layout
    [in, out]; reshape biases to broadcastable 2D rows. No padding."""
    hidden = w1.shape[0]
    out_size = w2.shape[0]
    w1_t = jnp.asarray(w1).T            # [in_size, hidden]
    w2_t = jnp.asarray(w2).T            # [hidden, out_size]
    b1_2d = jnp.asarray(b1).reshape(1, hidden)
    b2_2d = jnp.asarray(b2).reshape(1, out_size)
    return w1_t, b1_2d, w2_t, b2_2d


def qnetwork_forward(x, w1_t, b1_2d, w2_t, b2_2d):
    """x: [B, input_size]; params as produced by prepare_params.
    Matches PyTorch: y = relu(x @ W1.T + b1) @ W2.T + b2."""
    B, in_size = x.shape
    _, hidden = w1_t.shape
    _, out_size = w2_t.shape

    TM = _choose_tm(B)
    grid = (pl.cdiv(B, TM),)  # ragged last block handled by Pallas masking

    return pl.pallas_call(
        qnetwork_kernel,
        out_shape=jax.ShapeDtypeStruct((B, out_size), x.dtype),
        grid_spec=pl.GridSpec(
            grid=grid,
            in_specs=[
                # x: batch-tiled, double-buffered by the BlockSpec pipeline.
                pl.BlockSpec((TM, in_size), lambda i: (i, 0)),
                # Weights / biases: constant index maps -> fetched once, resident.
                pl.BlockSpec((in_size, hidden), lambda i: (0, 0)),
                pl.BlockSpec((1, hidden), lambda i: (0, 0)),
                pl.BlockSpec((hidden, out_size), lambda i: (0, 0)),
                pl.BlockSpec((1, out_size), lambda i: (0, 0)),
            ],
            # Output written at its true width; partial last block is masked.
            out_specs=pl.BlockSpec((TM, out_size), lambda i: (i, 0)),
        ),
        compiler_params=pltpu.CompilerParams(
            # Batch tiles are independent -> shard across both TCs on v7x.
            dimension_semantics=("parallel",),
        ),
    )(x, w1_t, b1_2d, w2_t, b2_2d)


def reference_forward(x, w1, b1, w2, b2):
    # Pure-JAX reference, also at HIGHEST precision for an apples-to-apples
    # f32 comparison (default TPU f32 matmul is bf16-truncated).
    h = jnp.maximum(
        jnp.dot(x, w1.T, precision=lax.Precision.HIGHEST) + b1, 0.0)
    return jnp.dot(h, w2.T, precision=lax.Precision.HIGHEST) + b2


if __name__ == "__main__":
    input_size, hidden_size, output_size = 16, 32, 8
    batch = 4

    key = jax.random.PRNGKey(0)
    k_x, k_w1, k_b1, k_w2, k_b2 = jax.random.split(key, 5)

    x = jax.random.normal(k_x, (batch, input_size), dtype=jnp.float32)
    # Deterministic init mimicking nn.Linear's uniform(-1/sqrt(fan_in), 1/sqrt(fan_in))
    bound1 = 1.0 / jnp.sqrt(input_size)
    w1 = jax.random.uniform(k_w1, (hidden_size, input_size),
                            minval=-bound1, maxval=bound1, dtype=jnp.float32)
    b1 = jax.random.uniform(k_b1, (hidden_size,),
                            minval=-bound1, maxval=bound1, dtype=jnp.float32)
    bound2 = 1.0 / jnp.sqrt(hidden_size)
    w2 = jax.random.uniform(k_w2, (output_size, hidden_size),
                            minval=-bound2, maxval=bound2, dtype=jnp.float32)
    b2 = jax.random.uniform(k_b2, (output_size,),
                            minval=-bound2, maxval=bound2, dtype=jnp.float32)

    # One-time parameter preparation (transpose to [K, N], bias reshape).
    w1_t, b1_2d, w2_t, b2_2d = prepare_params(w1, b1, w2, b2)

    out = qnetwork_forward(x, w1_t, b1_2d, w2_t, b2_2d)
    out = jax.block_until_ready(out)

    ref = reference_forward(x, w1, b1, w2, b2)
    assert out.shape == (batch, output_size)
    assert jnp.allclose(out, ref, atol=1e-5, rtol=1e-5), "mismatch vs reference"

    print("KERNEL_OK")
</pallas_src>

<mosaic_0001>
module attributes {stable_mosaic.version = 11 : i64} {
  func.func @qnetwork_kernel(%arg0: i32, %arg1: memref<8x16xf32, #tpu.memory_space<vmem>>, %arg2: memref<16x32xf32, #tpu.memory_space<vmem>>, %arg3: memref<1x32xf32, #tpu.memory_space<vmem>>, %arg4: memref<32x8xf32, #tpu.memory_space<vmem>>, %arg5: memref<1x8xf32, #tpu.memory_space<vmem>>, %arg6: memref<8x8xf32, #tpu.memory_space<vmem>>) attributes {dimension_semantics = [#tpu.dimension_semantics<parallel>], iteration_bounds = array<i64: 1>, scalar_prefetch = 0 : i64, scratch_operands = 0 : i64, tpu.core_type = #tpu.core_type<tc>, window_params = [{transform_indices = @transform_0, window_bounds = array<i64: 8, 16>}, {pipeline_mode = #tpu.pipeline_mode<synchronous>, transform_indices = @transform_1, window_bounds = array<i64: 16, 32>}, {pipeline_mode = #tpu.pipeline_mode<synchronous>, transform_indices = @transform_2, window_bounds = array<i64: 1, 32>}, {pipeline_mode = #tpu.pipeline_mode<synchronous>, transform_indices = @transform_3, window_bounds = array<i64: 32, 8>}, {pipeline_mode = #tpu.pipeline_mode<synchronous>, transform_indices = @transform_4, window_bounds = array<i64: 1, 8>}, {transform_indices = @transform_5, window_bounds = array<i64: 8, 8>}]} {
    %c0 = arith.constant 0 : index
    %c0_0 = arith.constant 0 : index
    %0 = vector.load %arg1[%c0, %c0_0] : memref<8x16xf32, #tpu.memory_space<vmem>>, vector<8x16xf32>
    %c0_1 = arith.constant 0 : index
    %c0_2 = arith.constant 0 : index
    %1 = vector.load %arg2[%c0_1, %c0_2] : memref<16x32xf32, #tpu.memory_space<vmem>>, vector<16x32xf32>
    %cst = arith.constant dense<0.000000e+00> : vector<8x32xf32>
    %2 = tpu.matmul %0, %1, %cst {dimension_numbers = #tpu.dot_dimension_numbers<[1], [0], [0], [1], [0, 0, 1, 1], [], []>, precision = #tpu.contract_precision<fp32>} : vector<8x16xf32>, vector<16x32xf32>, vector<8x32xf32> -> vector<8x32xf32>
    %c0_3 = arith.constant 0 : index
    %c0_4 = arith.constant 0 : index
    %3 = vector.load %arg3[%c0_3, %c0_4] : memref<1x32xf32, #tpu.memory_space<vmem>>, vector<1x32xf32>
    %4 = vector.broadcast %3 : vector<1x32xf32> to vector<8x32xf32>
    %5 = arith.addf %2, %4 : vector<8x32xf32>
    %cst_5 = arith.constant 0.000000e+00 : f32
    %6 = vector.broadcast %cst_5 : f32 to vector<8x32xf32>
    %7 = arith.maximumf %5, %6 : vector<8x32xf32>
    %c0_6 = arith.constant 0 : index
    %c0_7 = arith.constant 0 : index
    %8 = vector.load %arg4[%c0_6, %c0_7] : memref<32x8xf32, #tpu.memory_space<vmem>>, vector<32x8xf32>
    %cst_8 = arith.constant dense<0.000000e+00> : vector<8x8xf32>
    %9 = tpu.matmul %7, %8, %cst_8 {dimension_numbers = #tpu.dot_dimension_numbers<[1], [0], [0], [1], [0, 0, 1, 1], [], []>, precision = #tpu.contract_precision<fp32>} : vector<8x32xf32>, vector<32x8xf32>, vector<8x8xf32> -> vector<8x8xf32>
    %c0_9 = arith.constant 0 : index
    %c0_10 = arith.constant 0 : index
    %10 = vector.load %arg5[%c0_9, %c0_10] : memref<1x8xf32, #tpu.memory_space<vmem>>, vector<1x8xf32>
    %11 = vector.broadcast %10 : vector<1x8xf32> to vector<8x8xf32>
    %12 = arith.addf %9, %11 : vector<8x8xf32>
    %c0_11 = arith.constant 0 : index
    %c0_12 = arith.constant 0 : index
    %13 = vector.load %arg6[%c0_11, %c0_12] : memref<8x8xf32, #tpu.memory_space<vmem>>, vector<8x8xf32>
    tpu.vector_store %arg6[%c0_11, %c0_12], %12 {strides = array<i32>} : memref<8x8xf32, #tpu.memory_space<vmem>>, vector<8x8xf32>,
    return
  }
  func.func @transform_0(%arg0: i32) -> (i32, i32) {
    %c0_i32 = arith.constant 0 : i32
    %c0_i32_0 = arith.constant 0 : i32
    return %arg0, %c0_i32 : i32, i32
  }
  func.func @transform_1(%arg0: i32) -> (i32, i32) {
    %c0_i32 = arith.constant 0 : i32
    %c0_i32_0 = arith.constant 0 : i32
    %c0_i32_1 = arith.constant 0 : i32
    return %c0_i32, %c0_i32_0 : i32, i32
  }
  func.func @transform_2(%arg0: i32) -> (i32, i32) {
    %c0_i32 = arith.constant 0 : i32
    %c0_i32_0 = arith.constant 0 : i32
    %c0_i32_1 = arith.constant 0 : i32
    return %c0_i32, %c0_i32_0 : i32, i32
  }
  func.func @transform_3(%arg0: i32) -> (i32, i32) {
    %c0_i32 = arith.constant 0 : i32
    %c0_i32_0 = arith.constant 0 : i32
    %c0_i32_1 = arith.constant 0 : i32
    return %c0_i32, %c0_i32_0 : i32, i32
  }
  func.func @transform_4(%arg0: i32) -> (i32, i32) {
    %c0_i32 = arith.constant 0 : i32
    %c0_i32_0 = arith.constant 0 : i32
    %c0_i32_1 = arith.constant 0 : i32
    return %c0_i32, %c0_i32_0 : i32, i32
  }
  func.func @transform_5(%arg0: i32) -> (i32, i32) {
    %c0_i32 = arith.constant 0 : i32
    %c0_i32_0 = arith.constant 0 : i32
    return %arg0, %c0_i32 : i32, i32
  }
}

</mosaic_0001>

<bundles_post_ra>
// kernel: tpu_custom_call.1
= control target key start
LH: loop header
LB: loop body
LE: loop exit
PB: predicated region body
PF: predicated region fallthrough
CT: control target
= control target key end

     0   :  { %10 = vsyncpa [#allocation3], 0  ;;  %v1198_v2 = vmov 0.0   ;;  %vm31_vm0 = vcmask 130048   ;;  %vm1199_vm1 = vmmov 0   ;;  %vm506_vm2 = vcmask 261120   ;;  %s1383_s0 = inlined_call_operand.vmem [shape: f32[4,16], index: 0, kind: input, shape index: {}]   ;;  %s1384_s1 = inlined_call_operand.vmem [shape: f32[16,32], index: 1, kind: input, shape index: {}]   ;;  %s1385_s2 = inlined_call_operand.vmem [shape: f32[1,32], index: 2, kind: input, shape index: {}]   ;;  %s1386_s3 = inlined_call_operand.vmem [shape: f32[32,8], index: 3, kind: input, shape index: {}]   ;;  %s1387_s4 = inlined_call_operand.vmem [shape: f32[1,8], index: 4, kind: input, shape index: {}]   ;;  %s1388_s5 = inlined_call_operand.hbm [shape: f32[4,8], index: 5, kind: output, shape index: {}]  }
   0x1   :  { %v23_v0 = vld [vmem:[%s1384_s1 + $0x8] sm:$0xff]  ;;  %v22_v1 = vld [vmem:[%s1384_s1] sm:$0xff]  ;;  %1063 = vmatprep.subr.mxu0 %v1198_v2  ;;  %1070 = vmatprep.subr.mxu1 %v1198_v2  ;;  %v498_v20 = vld [vmem:[%s1386_s3 + $0x18] sm:$0xff]  ;;  %vm995_vm3 = vcmask 64512  }
   0x2   :  { %v64_v3 = vand.u32 4294901760, %v23_v0  ;;  %v67_v4 = vand.u32 4294901760, %v22_v1  ;;  %v21_v5 = vld [vmem:[%s1383_s0] sm:$0xff]  ;;  %1067 = vmatprep.mubr.msk.f32.mxu0 %vm1199_vm1, %v1198_v2  ;;  %1074 = vmatprep.mubr.msk.f32.mxu1 %vm1199_vm1, %v1198_v2  ;;  %v1275_v21 = vand.u32 4294901760, %v498_v20  ;;  %v497_v22 = vld [vmem:[%s1386_s3 + $0x10] sm:$0xff]  ;;  %v496_v25 = vld [vmem:[%s1386_s3 + $0x8] sm:$0xff] }
   0x3   :  { %v33_v6 = vsel %vm31_vm0, %v21_v5, 0  ;;  %v1283_v24 = vand.u32 4294901760, %v497_v22  ;;  %v1294_v28 = vand.u32 4294901760, %v496_v25  ;;  %v495_v29 = vld [vmem:[%s1386_s3] sm:$0xff] }
   0x4   :  { %1064 = vmatpush3.msra.mxu0 %v64_v3  ;;  %v142_v7 = vsub.f32 %v23_v0, %v64_v3  ;;  %v102_v8 = vand.u32 4294901760, %v33_v6  ;;  %v149_v9 = vsub.f32 %v22_v1, %v67_v4  ;;  %v1281_v23 = vsub.f32 %v498_v20, %v1275_v21  ;;  %v1013_v44 = vld [vmem:[%s1385_s2] ss:$0 sm:$0xff] }
   0x5   :  { %1065 = vmatprep.subr.mxu0 %v1198_v2  ;;  %v1292_v27 = vsub.f32 %v497_v22, %v1283_v24  ;;  %v1306_v32 = vsub.f32 %v496_v25, %v1294_v28  ;;  %v1308_v33 = vand.u32 4294901760, %v495_v29 }
   0x6   :  { %1066 = vmatpush3.msra.mxu0 %v67_v4  ;;  %v143_v10 = vand.u32 4294901760, %v142_v7  ;;  %v103_v11 = vsub.f32 %v33_v6, %v102_v8  ;;  %v150_v12 = vand.u32 4294901760, %v149_v9  ;;  %v616_v26 = vand.u32 4294901760, %v1281_v23 }
   0x7   :  { %1077 = vmatprep.subr.mxu0 %v1198_v2  ;;  %v623_v31 = vand.u32 4294901760, %v1292_v27  ;;  %v630_v36 = vand.u32 4294901760, %v1306_v32  ;;  %v1317_v37 = vsub.f32 %v495_v29, %v1308_v33 }
   0x8   :  { %v144_v13 = vsub.f32 %v142_v7, %v143_v10  ;;  %v104_v14 = vand.u32 4294901760, %v103_v11  ;;  %v151_v15 = vsub.f32 %v149_v9, %v150_v12  ;;  %v617_v30 = vsub.f32 %v1281_v23, %v616_v26 }
   0x9   :  { %v624_v35 = vsub.f32 %v1292_v27, %v623_v31  ;;  %v631_v39 = vsub.f32 %v1306_v32, %v630_v36  ;;  %v637_v40 = vand.u32 4294901760, %v1317_v37 }
   0xa   :  { %v145_v16 = vand.u32 4294901760, %v144_v13  ;;  %v105_v17 = vsub.f32 %v103_v11, %v104_v14  ;;  %v152_v18 = vand.u32 4294901760, %v151_v15  ;;  %v618_v34 = vand.u32 4294901760, %v617_v30  ;;  %v1014_v13 = vld [vmem:[%s1387_s4] ss:$0 sm:$0xff] }
   0xb   :  { %v625_v38 = vand.u32 4294901760, %v624_v35  ;;  %v632_v41 = vand.u32 4294901760, %v631_v39  ;;  %v638_v42 = vsub.f32 %v1317_v37, %v637_v40 }
   0xc   :  { %1071 = vmatpush3.msra.mxu1 %v145_v16  ;;  %v106_v19 = vand.u32 4294901760, %v105_v17 }
   0xd   :  { %1072 = vmatprep.subr.mxu1 %v1198_v2  ;;  %v639_v43 = vand.u32 4294901760, %v638_v42 }
   0xe   :  { %1068 = vmatmul.mubr.f32.vlgmr.msra.gmra.mxu0 %v106_v19  ;;  %1073 = vmatpush3.msra.mxu1 %v152_v18 }
   0xf   :  { %1078 = vmatpush3.msra.mxu0 %v142_v7  ;;  %1075 = vmatmul.mubr.f32.vlgmr.msra.gmra.mxu1 %v102_v8 }
  0x10   :  { %1079 = vmatprep.subr.mxu0 %v1198_v2  ;;  %1084 = vmatprep.subr.mxu1 %v1198_v2 }
  0x11   :  { %1080 = vmatpush3.msra.mxu0 %v149_v9  ;;  %1081 = vmatprep.mubr.msk.f32.mxu0 %vm1199_vm1, %v1198_v2 }
  0x12   :  { %1085 = vmatpush3.msra.mxu1 %v64_v3  ;;  %1082 = vmatmul.mubr.f32.vlgmr.msra.gmra.mxu0 %v103_v11 }
  0x13   :  { %1086 = vmatprep.subr.mxu1 %v1198_v2  ;;  %1091 = vmatprep.subr.mxu0 %v1198_v2 }
  0x14   :  { %1087 = vmatpush3.msra.mxu1 %v67_v4  ;;  %1088 = vmatprep.mubr.msk.f32.mxu1 %vm1199_vm1, %v1198_v2 }
  0x15   :  { %1092 = vmatpush3.msra.mxu0 %v143_v10  ;;  %1089 = vmatmul.mubr.f32.vlgmr.msra.gmra.mxu1 %v104_v14 }
  0x16   :  { %1093 = vmatprep.subr.mxu0 %v1198_v2  ;;  %1098 = vmatprep.subr.mxu1 %v1198_v2 }
  0x17   :  { %1094 = vmatpush3.msra.mxu0 %v150_v12  ;;  %1095 = vmatprep.mubr.msk.f32.mxu0 %vm1199_vm1, %v1198_v2 }
  0x18   :  { %1099 = vmatpush3.msra.mxu1 %v64_v3  ;;  %1096 = vmatmul.mubr.f32.vlgmr.msra.gmra.mxu0 %v102_v8 }
  0x19   :  { %1100 = vmatprep.subr.mxu1 %v1198_v2  ;;  %1102 = vmatprep.mubr.msk.f32.mxu1 %vm1199_vm1, %v1198_v2 }
  0x1a   :  { %1101 = vmatpush3.msra.mxu1 %v67_v4  ;;  %1105 = vmatprep.subr.mxu0 %v1198_v2 }
  0x1b   :  { %1103 = vmatmul.mubr.f32.vlgmr.msra.gmra.mxu1 %v102_v8  ;;  %1116 = vmatprep.subr.mxu1 %v1198_v2 }
  0x1c   :  { %1124 = vmatprep.mubr.msk.f32.mxu1 %vm1199_vm1, %v1198_v2  ;;  %1113 = vmatprep.mubr.msk.f32.mxu0 %vm1199_vm1, %v1198_v2 }
  0x1d   :  { %1106 = vmatpush3.msra.mxu0 %v1275_v21  ;;  %1117 = vmatpush3.msra.mxu1 %v618_v34 }
  0x1e   :  { %1107 = vmatprep.subr.mxu0 %v1198_v2  ;;  %1118 = vmatprep.subr.mxu1 %v1198_v2 }
  0x1f   :  { %1108 = vmatpush3.msra.mxu0 %v1283_v24  ;;  %1119 = vmatpush3.msra.mxu1 %v625_v38 }
  0x20   :  { %1109 = vmatprep.subr.mxu0 %v1198_v2  ;;  %1120 = vmatprep.subr.mxu1 %v1198_v2 }
  0x21   :  { %1110 = vmatpush3.msra.mxu0 %v1294_v28  ;;  %1121 = vmatpush3.msra.mxu1 %v632_v41 }
  0x22   :  { %1111 = vmatprep.subr.mxu0 %v1198_v2  ;;  %1122 = vmatprep.subr.mxu1 %v1198_v2 }
  0x23   :  { %1112 = vmatpush3.msra.mxu0 %v1308_v33  ;;  %1123 = vmatpush3.msra.mxu1 %v639_v43 }
  0x24   :  { %1127 = vmatprep.subr.mxu0 %v1198_v2  ;;  %1138 = vmatprep.subr.mxu1 %v1198_v2 }
  0xce   :  { %v108_v45 = vpop.f32.mrf.mxu0 }
  0xcf   :  { %v109_v46 = vadd.f32 %v1013_v44, %v108_v45  ;;  %v189_v47 = vpop.f32.mrf.mxu1 }
  0xd0   :  { %v1069_v48 = vpop.f32.mrf.mxu0 }
  0xd1   :  { %v190_v49 = vadd.f32 %v189_v47, %v109_v46  ;;  %v1076_v50 = vpop.f32.mrf.mxu1 }
  0xd2   :  { %v265_v51 = vpop.f32.mrf.mxu0 }
  0xd3   :  { %v266_v52 = vadd.f32 %v265_v51, %v190_v49 }
  0xd4   :  { %v1083_v53 = vpop.f32.mrf.mxu0 }
  0xd5   :  { %v340_v54 = vpop.f32.mrf.mxu1 }
  0xd6   :  { %v341_v55 = vadd.f32 %v340_v54, %v266_v52 }
  0xd7   :  { %v1090_v56 = vpop.f32.mrf.mxu1 }
  0xd8   :  { %v417_v57 = vpop.f32.mrf.mxu0 }
  0xd9   :  { %v418_v58 = vadd.f32 %v417_v57, %v341_v55 }
  0xda   :  { %v1097_v59 = vpop.f32.mrf.mxu0 }
  0xdb   :  { %v490_v60 = vpop.f32.mrf.mxu1 }
  0xdc   :  { %v491_v61 = vadd.f32 %v490_v60, %v418_v58 }
  0xdd   :  { %v1104_v62 = vpop.f32.mrf.mxu1 }
  0xde   :  { %v494_v63 = vmax.f32 %v491_v61, 0.0 }
  0xe0   :  { %v508_v0 = vsel %vm506_vm2, %v494_v63, 0 }
  0xe1   :  { %v579_v1 = vand.u32 4294901760, %v508_v0 }
  0xe3   :  { %v580_v3 = vsub.f32 %v508_v0, %v579_v1  ;;  %1125 = vmatmul.mubr.f32.vlgmr.msra.gmra.mxu1 %v579_v1 }
  0xe4   :  { %1139 = vmatpush3.msra.mxu1 %v1275_v21  ;;  %1146 = vmatprep.mubr.msk.f32.mxu1 %vm1199_vm1, %v1198_v2 }
  0xe5   :  { %1140 = vmatprep.subr.mxu1 %v1198_v2  ;;  %v581_v4 = vand.u32 4294901760, %v580_v3 }
  0xe6   :  { %1141 = vmatpush3.msra.mxu1 %v1283_v24 }
  0xe7   :  { %1142 = vmatprep.subr.mxu1 %v1198_v2  ;;  %v582_v5 = vsub.f32 %v580_v3, %v581_v4 }
  0xe8   :  { %1143 = vmatpush3.msra.mxu1 %v1294_v28 }
  0xe9   :  { %1144 = vmatprep.subr.mxu1 %v1198_v2  ;;  %v583_v6 = vand.u32 4294901760, %v582_v5 }
  0xea   :  { %1145 = vmatpush3.msra.mxu1 %v1308_v33 }
  0xeb   :  { %1147 = vmatmul.mubr.f32.vlgmr.msra.gmra.mxu1 %v581_v4  ;;  %1160 = vmatprep.subr.mxu1 %v1198_v2 }
  0xec   :  { %1114 = vmatmul.mubr.f32.vlgmr.msra.gmra.mxu0 %v583_v6  ;;  %1161 = vmatpush3.msra.mxu1 %v1275_v21 }
  0xed   :  { %1128 = vmatpush3.msra.mxu0 %v1281_v23  ;;  %1162 = vmatprep.subr.mxu1 %v1198_v2 }
  0xee   :  { %1129 = vmatprep.subr.mxu0 %v1198_v2  ;;  %1163 = vmatpush3.msra.mxu1 %v1283_v24 }
  0xef   :  { %1130 = vmatpush3.msra.mxu0 %v1292_v27  ;;  %1164 = vmatprep.subr.mxu1 %v1198_v2 }
  0xf0   :  { %1131 = vmatprep.subr.mxu0 %v1198_v2  ;;  %1165 = vmatpush3.msra.mxu1 %v1294_v28 }
  0xf1   :  { %1132 = vmatpush3.msra.mxu0 %v1306_v32  ;;  %1166 = vmatprep.subr.mxu1 %v1198_v2 }
  0xf2   :  { %1133 = vmatprep.subr.mxu0 %v1198_v2  ;;  %1135 = vmatprep.mubr.msk.f32.mxu0 %vm1199_vm1, %v1198_v2 }
  0xf3   :  { %1134 = vmatpush3.msra.mxu0 %v1317_v37  ;;  %1167 = vmatpush3.msra.mxu1 %v1308_v33 }
  0xf4   :  { %1168 = vmatprep.mubr.msk.f32.mxu1 %vm1199_vm1, %v1198_v2  ;;  %1136 = vmatmul.mubr.f32.vlgmr.msra.gmra.mxu0 %v580_v3 }
  0xf5   :  { %1149 = vmatprep.subr.mxu0 %v1198_v2  ;;  %1169 = vmatmul.mubr.f32.vlgmr.msra.gmra.mxu1 %v579_v1 }
  0xf6   :  { %1150 = vmatpush3.msra.mxu0 %v616_v26  ;;  %1157 = vmatprep.mubr.msk.f32.mxu0 %vm1199_vm1, %v1198_v2 }
  0xf7   :  { %1151 = vmatprep.subr.mxu0 %v1198_v2 }
  0xf8   :  { %1152 = vmatpush3.msra.mxu0 %v623_v31 }
  0xf9   :  { %1153 = vmatprep.subr.mxu0 %v1198_v2 }
  0xfa   :  { %1154 = vmatpush3.msra.mxu0 %v630_v36 }
  0xfb   :  { %1155 = vmatprep.subr.mxu0 %v1198_v2 }
  0xfc   :  { %1156 = vmatpush3.msra.mxu0 %v637_v40 }
  0xfd   :  { %1158 = vmatmul.mubr.f32.vlgmr.msra.gmra.mxu0 %v579_v1 }
 0x1a3   :  { %v676_v7 = vpop.f32.mrf.mxu1 }
 0x1a5   :  { %v1126_v8 = vpop.f32.mrf.mxu1 }
 0x1ab   :  { %v833_v9 = vpop.f32.mrf.mxu1 }
 0x1ac   :  { %v585_v10 = vpop.f32.mrf.mxu0 }
 0x1ad   :  { %v1148_v11 = vpop.f32.mrf.mxu1  ;;  %v586_v14 = vadd.f32 %v1014_v13, %v585_v10 }
 0x1ae   :  { %v1115_v12 = vpop.f32.mrf.mxu0 }
 0x1af   :  { %v677_v17 = vadd.f32 %v676_v7, %v586_v14 }
 0x1b4   :  { %v756_v15 = vpop.f32.mrf.mxu0 }
 0x1b5   :  { %v991_v16 = vpop.f32.mrf.mxu1  ;;  %v757_v19 = vadd.f32 %v756_v15, %v677_v17 }
 0x1b6   :  { %v1137_v18 = vpop.f32.mrf.mxu0 }
 0x1b7   :  { %v1170_v2 = vpop.f32.mrf.mxu1  ;;  %v834_v20 = vadd.f32 %v833_v9, %v757_v19 }
 0x1bd   :  { %v916_v21 = vpop.f32.mrf.mxu0 }
 0x1be   :  { %v917_v22 = vadd.f32 %v916_v21, %v834_v20 }
 0x1bf   :  { %v1159_v23 = vpop.f32.mrf.mxu0 }
 0x1c0   :  { %v992_v24 = vadd.f32 %v991_v16, %v917_v22 }
 0x1c2   :  { %996 = vst.msk [vmem:[#allocation2] sm:$0xff] %vm995_vm3, %v992_v24 }
 0x1c3   :  { %1001 = vsyncadd [#allocation3], 64  ;;  %s1200_s7 = smov [#allocation2]  }
 0x1c4   :  { %s1002_s8 = sshll.u32 %s1200_s7, 4  ;;  %s1003_s8 = int_to_ptr.vmem [resolvable:$true] %s1002_s8 }
 0x1c5   :  { %s1176_s9 = scalar_lea.vmem %s1003_s8, 64  ;;  %s1180_s4 = scalar_lea.vmem %s1003_s8, 128 }
 0x1c6   :  { %p1177_p0 = scmp.ne.s32.totalorder %s1003_s8, %s1176_s9  ;;  %p1181_p1 = scmp.lt.s32.totalorder %s1003_s8, %s1003_s8 }
 0x1c7   :  { %p1182_p2 = scmp.lt.s32.totalorder %s1180_s4, %s1176_s9 }
 0x1c9   :  { %p1183_p3 = por %p1182_p2, %p1181_p1 }
 0x1cb   :  { %p1184_p4 = pnand %p1183_p3, %p1177_p0 }
 0x1cd   :  { %1187 = shalt.err (!%p1184_p4)
}
 0x1ce   :  { %s1201_s10 = smov 64   ;;  %s1202_s11 = smov 4  }
 0x1cf   :  { %1008 = dma.vmem_to_hbm [thread:$0]  %s1003_s8, 64, %s1388_s5, [#allocation3], %s1201_s10, %s1201_s10, %s1202_s11  }
 0x1d0   :  { %1196 = dma.done.wait [#allocation3], 128  }
 0x1d1   :  { %1197 = vsyncadd [#allocation3], 4294967168 }
 0x1d2   :  { %1012 = vsyncpa [#allocation3], 1 }

</bundles_post_ra>
